<compile_context>
chip_gen: v7x
topology: tpu7x:2x2x1
jax: 0.10.0
libtpu: 0.0.40
codegen_flags: <defaults>
</compile_context>

<pallas_src>
import math

import jax
import jax.numpy as jnp
from jax import lax
from jax.experimental import pallas as pl
from jax.experimental.pallas import tpu as pltpu


def _round_up(x: int, m: int) -> int:
    return ((x + m - 1) // m) * m


def _round_down(x: int, m: int) -> int:
    return (x // m) * m


def _scores_kernel(q_ref, k_ref, o_ref):
    """One grid step = (batch b, q-tile iq, k-tile ik).

    Blocks: q_ref (1, TQ, Dp), k_ref (1, TK, Dp), o_ref (1, TQ, TK).
    att[i, k] = sum_j q[i, j] * k[k, j]  -> NT matmul on the MXU, f32 accumulation.
    """
    att = lax.dot_general(
        q_ref[0], k_ref[0],
        dimension_numbers=(((1,), (1,)), ((), ())),
        preferred_element_type=jnp.float32)
    o_ref[0] = att.astype(o_ref.dtype)


def key_query_attention(query, key, w_q, b_q, w_k, b_k, d_k, *,
                        tq=512, tk=2048,
                        score_dtype=jnp.bfloat16,   # MXU operand dtype (f32 acc)
                        out_dtype=None):
    """Pallas implementation of KeyQueryAttention.forward.

    query: (B, Lq, dim_query), key: (B, Lk, dim_key)
    w_q: (d_k, dim_query), b_q: (d_k,), w_k: (d_k, dim_key), b_k: (d_k,)
    returns att: (B, Lq, Lk) == einsum('bij,bkj->bik', W_q(query), W_k(key)) / sqrt(d_k)
    """
    B, Lq, Dq = query.shape
    Bk, Lk, Dk = key.shape
    assert Bk == B, "query/key batch mismatch"
    out_dtype = query.dtype if out_dtype is None else out_dtype
    temperature = 1.0 / math.sqrt(d_k)

    # ---- Hoisted projections: run ONCE as plain XLA GEMMs (not per tile). -------
    # Temperature folded into w_q / b_q (numerically exact); weights pre-transposed
    # to (D, d_kp) with d_k zero-padded to a lane-dense 128 (padded columns are
    # exactly zero in both q_proj and k_proj, so they contribute nothing).
    d_kp = _round_up(max(d_k, 1), 128)
    wq_t = jnp.zeros((Dq, d_kp), jnp.float32).at[:, :d_k].set(
        (w_q.astype(jnp.float32) * temperature).T)
    wk_t = jnp.zeros((Dk, d_kp), jnp.float32).at[:, :d_k].set(
        w_k.astype(jnp.float32).T)
    bq_p = jnp.zeros((d_kp,), jnp.float32).at[:d_k].set(
        b_q.astype(jnp.float32) * temperature)
    bk_p = jnp.zeros((d_kp,), jnp.float32).at[:d_k].set(b_k.astype(jnp.float32))

    q_proj = (jnp.dot(query.astype(jnp.float32), wq_t) + bq_p).astype(score_dtype)
    k_proj = (jnp.dot(key.astype(jnp.float32), wk_t) + bk_p).astype(score_dtype)

    # ---- Tile sizes. TQ sublane-aligned (x8), TK lane-dense (x128). -------------
    # Exact out_shape + cdiv grid: edge blocks are masked by Pallas, no pad/slice.
    if Lq <= tq:
        TQ = Lq                              # full-dim block: always legal
    else:
        TQ = max(8, _round_down(tq, 8))
    if Lk <= tk:
        TK = Lk
    else:
        TK = max(128, _round_down(tk, 128))

    grid = (B, pl.cdiv(Lq, TQ), pl.cdiv(Lk, TK))

    # ---- VMEM budget: double-buffered q/k/out tiles + headroom, capped well under
    # physical VMEM (v7x has only 64 MiB per TensorCore).
    s_item = jnp.dtype(score_dtype).itemsize
    o_item = jnp.dtype(out_dtype).itemsize
    db_bytes = 2 * (TQ * d_kp * s_item + TK * d_kp * s_item + TQ * TK * o_item)
    try:
        vmem_cap = int(pltpu.get_tpu_info().vmem_capacity_bytes)
    except Exception:
        vmem_cap = 64 * 1024 * 1024          # conservative: v7x per-TC VMEM
    vmem_limit = int(min(int(0.75 * vmem_cap),
                         max(16 * 1024 * 1024, db_bytes + 8 * 1024 * 1024)))

    out = pl.pallas_call(
        _scores_kernel,
        out_shape=jax.ShapeDtypeStruct((B, Lq, Lk), out_dtype),
        grid_spec=pltpu.PrefetchScalarGridSpec(
            num_scalar_prefetch=0,
            grid=grid,
            in_specs=[
                pl.BlockSpec((1, TQ, d_kp), lambda b, iq, ik: (b, iq, 0)),  # q_proj tile
                pl.BlockSpec((1, TK, d_kp), lambda b, iq, ik: (b, ik, 0)),  # k_proj tile
            ],
            out_specs=pl.BlockSpec((1, TQ, TK), lambda b, iq, ik: (b, iq, ik)),
        ),
        compiler_params=pltpu.CompilerParams(
            dimension_semantics=("parallel", "parallel", "parallel"),
            vmem_limit_bytes=vmem_limit),
    )(q_proj, k_proj)

    return out


def _reference(query, key, w_q, b_q, w_k, b_k, d_k):
    qp = jnp.einsum("bij,dj->bid", query, w_q) + b_q
    kp = jnp.einsum("bkj,dj->bkd", key, w_k) + b_k
    return jnp.einsum("bid,bkd->bik", qp, kp) * (1.0 / math.sqrt(d_k))


if __name__ == "__main__":
    # Small shapes consistent with the module.
    B = 2
    Lq, Lk = 8, 8
    dim_query, dim_key = 32, 32
    d_k = 16

    root = jax.random.PRNGKey(0)
    kq, kk, kwq, kbq, kwk, kbk = jax.random.split(root, 6)

    query = jax.random.normal(kq, (B, Lq, dim_query), dtype=jnp.float32)
    key = jax.random.normal(kk, (B, Lk, dim_key), dtype=jnp.float32)

    # Deterministic parameter init (uniform in +-1/sqrt(fan_in), like nn.Linear).
    bound_q = 1.0 / math.sqrt(dim_query)
    bound_k = 1.0 / math.sqrt(dim_key)
    w_q = jax.random.uniform(kwq, (d_k, dim_query), jnp.float32, -bound_q, bound_q)
    b_q = jax.random.uniform(kbq, (d_k,), jnp.float32, -bound_q, bound_q)
    w_k = jax.random.uniform(kwk, (d_k, dim_key), jnp.float32, -bound_k, bound_k)
    b_k = jax.random.uniform(kbk, (d_k,), jnp.float32, -bound_k, bound_k)

    ref = _reference(query, key, w_q, b_q, w_k, b_k, d_k)

    # Exact-precision path (f32 MXU operands): tight tolerance vs reference.
    att_f32 = key_query_attention(query, key, w_q, b_q, w_k, b_k, d_k,
                                  score_dtype=jnp.float32)
    att_f32 = jax.block_until_ready(att_f32)
    assert att_f32.shape == (B, Lq, Lk)
    assert jnp.allclose(att_f32, ref, atol=1e-4, rtol=1e-4), "f32 mismatch vs reference"

    # Default fast path (bf16 MXU operands, f32 accumulation): looser tolerance.
    att_bf16 = key_query_attention(query, key, w_q, b_q, w_k, b_k, d_k)
    att_bf16 = jax.block_until_ready(att_bf16)
    assert att_bf16.shape == (B, Lq, Lk)
    assert jnp.allclose(att_bf16, ref, atol=5e-2, rtol=5e-2), "bf16 mismatch vs reference"

    print("KERNEL_OK")
</pallas_src>

<mosaic_0001>
module attributes {stable_mosaic.version = 11 : i64} {
  func.func @_scores_kernel(%arg0: i32, %arg1: i32, %arg2: i32, %arg3: memref<1x8x128xf32, #tpu.memory_space<vmem>>, %arg4: memref<1x8x128xf32, #tpu.memory_space<vmem>>, %arg5: memref<1x8x8xf32, #tpu.memory_space<vmem>>) attributes {dimension_semantics = [#tpu.dimension_semantics<parallel>, #tpu.dimension_semantics<parallel>, #tpu.dimension_semantics<parallel>], iteration_bounds = array<i64: 2, 1, 1>, scalar_prefetch = 0 : i64, scratch_operands = 0 : i64, tpu.core_type = #tpu.core_type<tc>, window_params = [{transform_indices = @transform_0, window_bounds = array<i64: 1, 8, 128>}, {transform_indices = @transform_1, window_bounds = array<i64: 1, 8, 128>}, {transform_indices = @transform_2, window_bounds = array<i64: 1, 8, 8>}]} {
    %c0 = arith.constant 0 : index
    %c0_0 = arith.constant 0 : index
    %c0_1 = arith.constant 0 : index
    %0 = vector.load %arg3[%c0, %c0_0, %c0_1] : memref<1x8x128xf32, #tpu.memory_space<vmem>>, vector<1x8x128xf32>
    %1 = vector.shape_cast %0 : vector<1x8x128xf32> to vector<8x128xf32>
    %c0_2 = arith.constant 0 : index
    %c0_3 = arith.constant 0 : index
    %c0_4 = arith.constant 0 : index
    %2 = vector.load %arg4[%c0_2, %c0_3, %c0_4] : memref<1x8x128xf32, #tpu.memory_space<vmem>>, vector<1x8x128xf32>
    %3 = vector.shape_cast %2 : vector<1x8x128xf32> to vector<8x128xf32>
    %cst = arith.constant dense<0.000000e+00> : vector<8x8xf32>
    %4 = tpu.matmul %1, %3, %cst {dimension_numbers = #tpu.dot_dimension_numbers<[1], [1], [0], [0], [0, 0, 1, 0], [], []>} : vector<8x128xf32>, vector<8x128xf32>, vector<8x8xf32> -> vector<8x8xf32>
    %c0_5 = arith.constant 0 : index
    %c0_6 = arith.constant 0 : index
    %c0_7 = arith.constant 0 : index
    %5 = vector.load %arg5[%c0_5, %c0_6, %c0_7] : memref<1x8x8xf32, #tpu.memory_space<vmem>>, vector<1x8x8xf32>
    %6 = vector.shape_cast %5 : vector<1x8x8xf32> to vector<8x8xf32>
    %7 = vector.shape_cast %4 : vector<8x8xf32> to vector<1x8x8xf32>
    tpu.vector_store %arg5[%c0_5, %c0_6, %c0_7], %7 {strides = array<i32>} : memref<1x8x8xf32, #tpu.memory_space<vmem>>, vector<1x8x8xf32>,
    return
  }
  func.func @transform_0(%arg0: i32, %arg1: i32, %arg2: i32) -> (i32, i32, i32) {
    %c0_i32 = arith.constant 0 : i32
    %c0_i32_0 = arith.constant 0 : i32
    return %arg0, %arg1, %c0_i32 : i32, i32, i32
  }
  func.func @transform_1(%arg0: i32, %arg1: i32, %arg2: i32) -> (i32, i32, i32) {
    %c0_i32 = arith.constant 0 : i32
    %c0_i32_0 = arith.constant 0 : i32
    return %arg0, %arg2, %c0_i32 : i32, i32, i32
  }
  func.func @transform_2(%arg0: i32, %arg1: i32, %arg2: i32) -> (i32, i32, i32) {
    %c0_i32 = arith.constant 0 : i32
    return %arg0, %arg1, %arg2 : i32, i32, i32
  }
}

</mosaic_0001>

<bundles_post_ra>
// kernel: tpu_custom_call.1
= control target key start
LH: loop header
LB: loop body
LE: loop exit
PB: predicated region body
PF: predicated region fallthrough
CT: control target
= control target key end

     0   :  { %7 = vsyncpa [#allocation3], 0  ;;  %s903_s0 = inlined_call_operand.hbm [shape: f32[2,8,128], index: 0, kind: input, shape index: {}]   ;;  %s904_s1 = inlined_call_operand.hbm [shape: f32[2,8,128], index: 1, kind: input, shape index: {}]   ;;  %s905_s2 = inlined_call_operand.hbm [shape: f32[2,8,8], index: 2, kind: output, shape index: {}]  }
   0x1   :  { %9 = vsyncpa [#allocation3 + $0x1], 0 }
   0x2   :  { %10 = vsyncpa [#allocation6], 0 }
   0x3   :  { %12 = vsyncpa [#allocation6 + $0x1], 0 }
   0x4   :  { %13 = vsyncpa [#allocation4], 0 }
   0x5   :  { %15 = vsyncpa [#allocation4 + $0x1], 0  ;;  %s683_s9 = smov 0   ;;  %s685_s10 = smov 0  }
   0x6   :  { %s687_s11 = smov 0   ;;  %s689_s12 = smov 0  }
   0x7   :  { %s691_s13 = smov 0   ;;  %s693_s14 = smov 0  }
   0x8 LB: > { %s423_s15 = sadd.s32 4294967295, %s661_s14   ;;  %s424_s16 = sadd.s32 4294967294, %s661_s14   ;;  %s661_s14 = sphi %s693_s14, %s21_s14   ;;  %s657_s13 = sphi %s691_s13, %s925_s13   ;;  %s653_s12 = sphi %s689_s12, %s924_s12   ;;  %s649_s11 = sphi %s687_s11, %s923_s11   ;;  %s645_s10 = sphi %s685_s10, %s922_s10   ;;  %s641_s9 = sphi %s683_s9, %s921_s9  }
   0x9   : > { %s40_s17 = sadd.s32 1, %s657_s13  ;;  %s49_s18 = sadd.s32 1, %s649_s11 }
   0xa   : > { %p42_p0 = scmp.ge.s32.totalorder %s40_s17, 2  ;;  %p56_p1 = scmp.ne.s32.totalorder %s649_s11, %s645_s10 }
   0xb   : > { %p57_p2 = scmp.eq.s32.totalorder %s661_s14, 0  ;;  %p62_p3 = scmp.ne.s32.totalorder %s645_s10, %s641_s9 }
   0xc   : > { %s927_s17 = smov (%p42_p0, %s40_s17), 0  ;;  %p63_p5 = scmp.eq.s32.totalorder %s423_s15, 0 }
   0xd   : > { %p724_p4 = por %p57_p2, %p56_p1  ;;  %s44_s20 = ssub.s32 %s657_s13, %s927_s17 }
   0xe   : > { %p118_p6 = scmp.eq.s32.totalorder %s423_s15, 1  ;;  %p47_p7 = scmp.eq.s32.totalorder %s44_s20, 0 }
   0xf   : > { %p730_p8 = por %p63_p5, %p62_p3  ;;  %p124_p10 = scmp.eq.s32.totalorder %s424_s16, 1 }
  0x10   : > { %p734_p9 = por %p118_p6, %p56_p1  ;;  %p463_p13 = scmp.lt.s32.totalorder %s661_s14, 2 }
  0x11   : > { %s909_s21 = scalar_select %p730_p8, 1, 0 }
  0x12   : > { %s910_s22 = scalar_select %p734_p9, 1, 0 }
  0x13   : > { %s739_s23 = scalar_select %p47_p7, %s649_s11, %s49_s18  }
  0x14   : > { %p741_p11 = por %p124_p10, %p62_p3  ;;  %s748_s25 = sand.u32 1, %s649_s11  }
  0x15   : > { %s427_s26 = sshll.u32 %s748_s25, 3  ;;  %s428_s27 = sshll.u32 %s657_s13, 7 }
  0x16   : > { %s911_s24 = scalar_select %p741_p11, 1, 0 }
  0x17   : > { %s757_s30 = scalar_lea.hbm %s903_s0, %s428_s27  ;;  %s148_s3 = scalar_lea.vmem [#allocation2], %s427_s26 }
  0x18   : > { %s156_s4 = sshll.u32 %s148_s3, 4  ;;  %p765_p0 = pnand %p463_p13, %p724_p4  ;;  %s761_s4 = int_to_ptr.vmem [resolvable:$true] %s156_s4 }
  0x19   : > { %s145_s6 = scalar_lea.sflag [#allocation3], %s748_s25  ;;  %s515_s7 = scalar_lea.hbm %s757_s30, 128 }
  0x1a   : > { %p516_p3 = scmp.ne.s32.totalorder %s757_s30, %s515_s7  ;;  %p517_p5 = pneg %p765_p0 }
  0x1b   : > { %s520_s16 = scalar_lea.hbm %s903_s0, 256  ;;  %p521_p4 = scmp.lt.u32.totalorder %s757_s30, %s903_s0 }
  0x1c   : > { %p518_p6 = pnand %p517_p5, %p516_p3  ;;  %p522_p10 = scmp.lt.u32.totalorder %s520_s16, %s515_s7 }
  0x1d   : > { %p524_p12 = scmp.lt.u32.totalorder %s515_s7, %s757_s30 }
  0x1e   : > { %p519_p7 = pneg %p518_p6  ;;  %p523_p13 = por %p522_p10, %p521_p4 }
  0x20   : > { %p525_p1 = por %p524_p12, %p523_p13 }
  0x22   : > { %p526_p2 = pnand %p525_p1, %p519_p7 }
  0x24   : > { %529 = shalt.err (!%p526_p2)
}
  0x25   : > { %s530_s20 = scalar_lea.vmem %s761_s4, 128  ;;  %s663_s28 = smov [#allocation2]  }
  0x26   : > { %p531_p3 = scmp.ne.s32.totalorder %s761_s4, %s530_s20  ;;  %s535_s29 = sshll.u32 %s663_s28, 4  ;;  %s536_s29 = int_to_ptr.vmem [resolvable:$false] %s535_s29 }
  0x27   : > { %s537_s3 = scalar_lea.vmem %s536_s29, 256  ;;  %p538_p9 = scmp.lt.s32.totalorder %s761_s4, %s536_s29 }
  0x28   : > { %p533_p6 = pnand %p531_p3, %p517_p5  ;;  %p539_p4 = scmp.lt.s32.totalorder %s537_s3, %s530_s20 }
  0x2a   : > { %p534_p11 = pneg %p533_p6  ;;  %p540_p10 = por %p539_p4, %p538_p9 }
  0x2c   : > { %p541_p12 = pnand %p540_p10, %p534_p11 }
  0x2e   : > { %544 = shalt.err (!%p541_p12)
}
  0x2f   : > { %455 = dma.hbm_to_vmem [thread:$0]  (!%p765_p0), %s757_s30, 128, %s761_s4, %s145_s6  }
  0x30   : > { %p913_p1 = scmp.lt.s32.totalorder %s661_s14, 3  ;;  %p914_p2 = scmp.ge.s32.totalorder %s661_s14, 1 }
  0x31   : > { %s810_s16 = scalar_lea.hbm %s904_s1, %s428_s27  ;;  %s167_s18 = scalar_lea.vmem [#allocation5], %s427_s26 }
  0x32   : > { %p801_p7 = pnand %p914_p2, %p913_p1  ;;  %s175_s19 = sshll.u32 %s167_s18, 4  ;;  %s176_s19 = int_to_ptr.vmem [resolvable:$true] %s175_s19 }
  0x33   : > { %s164_s30 = scalar_lea.sflag [#allocation6], %s748_s25  ;;  %s545_s4 = scalar_lea.hbm %s810_s16, 128 }
  0x34   : > { %s915_s7 = scalar_select %p801_p7, 1, 0 }
  0x35   : > { %p546_p9 = scmp.ne.s32.totalorder %s810_s16, %s545_s4  ;;  %s550_s27 = scalar_lea.hbm %s904_s1, 256 }
  0x36   : > { %p551_p3 = scmp.lt.u32.totalorder %s810_s16, %s904_s1  ;;  %p552_p6 = scmp.lt.u32.totalorder %s550_s27, %s545_s4 }
  0x37   : > { %p548_p11 = pnand %p546_p9, %p517_p5  ;;  %p554_p10 = scmp.lt.u32.totalorder %s545_s4, %s810_s16 }
  0x38   : > { %p553_p4 = por %p552_p6, %p551_p3 }
  0x39   : > { %p549_p13 = pneg %p548_p11 }
  0x3a   : > { %p555_p12 = por %p554_p10, %p553_p4 }
  0x3c   : > { %p556_p1 = pnand %p555_p12, %p549_p13 }
  0x3e   : > { %559 = shalt.err (!%p556_p1)
}
  0x3f   : > { %s560_s25 = scalar_lea.vmem %s176_s19, 128  ;;  %s664_s26 = smov [#allocation5]  }
  0x40   : > { %p561_p2 = scmp.ne.s32.totalorder %s176_s19, %s560_s25  ;;  %s565_s3 = sshll.u32 %s664_s26, 4  ;;  %s566_s3 = int_to_ptr.vmem [resolvable:$false] %s565_s3 }
  0x41   : > { %s567_s8 = scalar_lea.vmem %s566_s3, 256  ;;  %p568_p8 = scmp.lt.s32.totalorder %s176_s19, %s566_s3 }
  0x42   : > { %p563_p9 = pnand %p561_p2, %p517_p5  ;;  %p569_p7 = scmp.lt.s32.totalorder %s567_s8, %s560_s25 }
  0x44   : > { %p564_p11 = pneg %p563_p9  ;;  %p570_p3 = por %p569_p7, %p568_p8 }
  0x46   : > { %p571_p6 = pnand %p570_p3, %p564_p11 }
  0x48   : > { %574 = shalt.err (!%p571_p6)
}
  0x49   : > { %458 = dma.hbm_to_vmem [thread:$0]  (!%p765_p0), %s810_s16, 128, %s176_s19, %s164_s30  }
  0x4a   : > { %p916_p13 = scmp.ne.s32.totalorder %s915_s7, 0 }
  0x4b   : > { %s837_s15 = sand.u32 (!%p916_p13), 1, %s645_s10   ;;  %p917_p5 = scmp.ne.s32.totalorder (!%p916_p13), %s909_s21, 0 }
  0x4c   : > { %184 = sbr.rel (%p916_p13) target bundleno = 317 (0x13d), region = 28  ;;  %s432_s18 = sshll.u32 (!%p916_p13), %s837_s15, 3 }
  0x4d   : > { %s187_s4 = scalar_lea.sflag (!%p916_p13), [#allocation3], %s837_s15  ;;  %s190_s6 = scalar_lea.vmem (!%p916_p13), [#allocation2], %s432_s18 }
  0x53   : > { %628 = dma.done.wait (%p917_p5), %s187_s4, 128  }
  0x54   : > { %630 = vsyncadd (%p917_p5), %s187_s4, 4294967168  ;;  %s196_s5 = scalar_lea.sflag [#allocation6], %s837_s15  ;;  %s199_s16 = scalar_lea.vmem [#allocation5], %s432_s18 }
  0x55   : > { %632 = dma.done.wait (%p917_p5), %s196_s5, 128  }
  0x56   : > { %634 = vsyncadd (%p917_p5), %s196_s5, 4294967168  ;;  %v665_v0 = vmov 0.0   ;;  %vm666_vm0 = vmmov 0   ;;  %v226_v1 = vld [vmem:[%s199_s16] sm:$0xff]  ;;  %v225_v2 = vld [vmem:[%s190_s6] sm:$0xff]  ;;  %s436_s7 = sshll.u32 %s653_s12, 7 }
  0x57   : > { %441 = vmatprep.subr.mxu0 %v665_v0  ;;  %443 = vmatprep.mubr.msk.f32.mxu0 %vm666_vm0, %v665_v0  ;;  %s224_s19 = scalar_lea.vmem [#allocation7], %s432_s18  ;;  %vm297_vm1 = vcmask 64512   ;;  %s854_s21 = scalar_lea.hbm %s905_s2, %s436_s7 }
  0x58   : > { %442 = vmatpush3.xpose.msra.mxu0 %v226_v1  ;;  %s315_s30 = sshll.u32 %s224_s19, 4  ;;  %s300_s28 = scalar_lea.sflag [#allocation4], %s837_s15  ;;  %s856_s30 = int_to_ptr.vmem [resolvable:$true] %s315_s30 }
  0x59   : > { %s575_s29 = scalar_lea.vmem %s856_s30, 128  ;;  %p918_p0 = scmp.ne.s32.totalorder %s910_s22, 0 }
  0x5a   : > { %p576_p8 = scmp.ne.s32.totalorder %s856_s30, %s575_s29  ;;  %s667_s12 = smov [#allocation7]  }
  0x5b   : > { %444 = vmatmul.mubr.f32.vlgmr.msra.gmra.mrb[0].mxu0 %v225_v2  ;;  %s579_s25 = sshll.u32 %s667_s12, 4  ;;  %s580_s25 = int_to_ptr.vmem [resolvable:$false] %s579_s25 }
  0x5c   : > { %p577_p7 = pnand %p576_p8, %p918_p0  ;;  %s581_s26 = scalar_lea.vmem %s580_s25, 256 }
  0x5d   : > { %p582_p10 = scmp.lt.s32.totalorder %s856_s30, %s580_s25  ;;  %p583_p12 = scmp.lt.s32.totalorder %s581_s26, %s575_s29 }
  0x5e   : > { %p578_p4 = pneg %p577_p7 }
  0x5f   : > { %p584_p1 = por %p583_p12, %p582_p10 }
  0x61   : > { %p585_p2 = pnand %p584_p1, %p578_p4 }
 0x12e   : > { %v293_v3 = vpop.f32.mrb[0].mxu0 }
 0x12f   : > { %298 = vst.msk [vmem:[%s224_s19] sm:$0xff] %vm297_vm1, %v293_v3  ;;  %v445_v4 = vpop.f32.mrb[1].mxu0 }
 0x130   : > { %588 = shalt.err (!%p585_p2)
}
 0x131   : > { %s589_s3 = scalar_lea.hbm %s854_s21, 128  ;;  %s593_s18 = scalar_lea.hbm %s905_s2, 256 }
 0x132   : > { %p590_p9 = scmp.ne.s32.totalorder %s854_s21, %s589_s3  ;;  %p594_p6 = scmp.lt.u32.totalorder %s854_s21, %s905_s2 }
 0x133   : > { %p595_p13 = scmp.lt.u32.totalorder %s593_s18, %s589_s3  ;;  %p597_p8 = scmp.lt.u32.totalorder %s589_s3, %s854_s21 }
 0x134   : > { %p591_p11 = pnand %p590_p9, %p918_p0 }
 0x135   : > { %p596_p5 = por %p595_p13, %p594_p6 }
 0x136   : > { %p592_p3 = pneg %p591_p11 }
 0x137   : > { %p598_p7 = por %p597_p8, %p596_p5 }
 0x139   : > { %p599_p4 = pnand %p598_p7, %p592_p3 }
 0x13b   : > { %602 = shalt.err (!%p599_p4)
}
 0x13c   : > { %450 = dma.vmem_to_hbm [thread:$0]  (%p918_p0), %s856_s30, 128, %s854_s21, %s300_s28  }
 0x13d PF: > { %s327_s5 = sand.u32 1, %s641_s9   ;;  %p919_p10 = scmp.ne.s32.totalorder %s911_s24, 0 }
 0x13e   : > { %p920_p12 = scmp.ge.s32.totalorder %s661_s14, 2  ;;  %s328_s16 = scalar_lea.sflag [#allocation4], %s327_s5 }
 0x140   : > { %p460_p1 = pnand %p920_p12, %p919_p10 }
 0x142   : > { %636 = dma.done.wait (!%p460_p1), %s328_s16, 128  }
 0x143   : > { %638 = vsyncadd (!%p460_p1), %s328_s16, 4294967168  ;;  %s21_s14 = sadd.s32 1, %s661_s14   ;;  %s921_s9 = smov %s645_s10 }
 0x144   : > { %p18_p2 = scmp.ge.s32.totalorder %s21_s14, 4   ;;  %s922_s10 = smov %s649_s11 }
 0x145   : > { %s923_s11 = smov %s739_s23  ;;  %s924_s12 = smov %s657_s13 }
 0x146   : > { %s925_s13 = smov %s927_s17  ;;  %20 = sbr.rel (!%p18_p2) target bundleno = 8 (0x8), region = 86 }
 0x14d   :  { %333 = vsyncpa [#allocation3], 1 }
 0x14e   :  { %335 = vsyncpa [#allocation3 + $0x1], 1 }
 0x14f   :  { %336 = vsyncpa [#allocation6], 1 }
 0x150   :  { %338 = vsyncpa [#allocation6 + $0x1], 1 }
 0x151   :  { %339 = vsyncpa [#allocation4], 1 }
 0x152   :  { %341 = vsyncpa [#allocation4 + $0x1], 1 }

</bundles_post_ra>
